<compile_context>
chip_gen: v6e
topology: v6e:2x2x1
jax: 0.10.0
libtpu: 0.0.40
codegen_flags: <defaults>
</compile_context>

<pallas_src>
import jax
import jax.numpy as jnp
import numpy as np
from jax.experimental import pallas as pl
from jax.experimental.pallas import tpu as pltpu


def _fused_conv_bn_pool_lrelu_kernel(p_ref, w_ref, s_ref, o_ref):
    # p: (M, K)   im2col patches, rows grouped as [corner00|corner01|corner10|
    #             corner11|(cropped leftovers)].
    # w: (K, C)   conv weights, (kh, kw, cin) row order matching the patches.
    # s: (2, C)   rows = [BN gamma, BN beta].
    # o: (Mp, C)  pooled + leaky-relu output.
    #
    # Conv as a single MXU matmul with f32 accumulation.  No conv bias: it
    # cancels exactly under training-mode BN mean subtraction (see wrapper).
    y = jnp.dot(p_ref[...], w_ref[...], preferred_element_type=jnp.float32)

    # BatchNorm (training-mode batch stats), two-pass for numerical safety:
    # mean first, then the centered sum of squares (no E[y^2]-E[y]^2
    # cancellation).  y is VMEM-resident so the extra sweep is cheap.
    m = y.shape[0]
    inv_m = 1.0 / m
    mean = jnp.sum(y, axis=0, keepdims=True) * inv_m
    c = y - mean
    var = jnp.sum(c * c, axis=0, keepdims=True) * inv_m     # biased variance
    scale = jax.lax.rsqrt(var + 1e-5) * s_ref[0:1, :]        # gamma*rsqrt(var+eps)
    ynorm = c * scale + s_ref[1:2, :]                        # + beta

    # 2x2 max-pool: rows are pre-grouped by pool corner, so the pool is an
    # elementwise max over four contiguous, sublane-aligned row blocks.
    mp = o_ref.shape[0]
    pooled = jnp.maximum(
        jnp.maximum(ynorm[0 * mp:1 * mp, :], ynorm[1 * mp:2 * mp, :]),
        jnp.maximum(ynorm[2 * mp:3 * mp, :], ynorm[3 * mp:4 * mp, :]))

    # LeakyReLU(0.01)
    o_ref[...] = jnp.where(pooled >= 0, pooled, 0.01 * pooled)


def conv_block_e(x_nchw, w, b, gamma, beta):
    N, Cin, H, W = x_nchw.shape
    Cout, _, KH, KW = w.shape
    OH, OW = H - KH + 1, W - KW + 1          # 'valid' conv, stride 1
    PH, PW = OH // 2, OW // 2                # MaxPool2d(2, 2) (floor)
    K = KH * KW * Cin
    Mp = N * PH * PW

    # The in-kernel pool slices ynorm[k*Mp:(k+1)*Mp] are only sublane-aligned
    # when each corner group is a multiple of 8 rows.
    # TODO(synk): pad each corner group to a multiple of 8 rows (masking the
    # pad out of the BN sums) to support arbitrary N/H/W.
    assert Mp % 8 == 0, "corner groups must be a multiple of 8 rows"

    # ---- XLA glue: NCHW -> NHWC + im2col, rows grouped by pool corner ----
    x = jnp.transpose(x_nchw, (0, 2, 3, 1)).astype(jnp.float32)
    taps = [x[:, i:i + OH, j:j + OW, :] for i in range(KH) for j in range(KW)]
    pat4 = jnp.stack(taps, axis=3).reshape(N, OH, OW, K)     # (kh,kw,cin) order

    groups = [pat4[:, d:2 * PH:2, e:2 * PW:2, :].reshape(Mp, K)
              for d in (0, 1) for e in (0, 1)]
    # Conv outputs cropped by the floor-pool still feed the BN statistics.
    if OH > 2 * PH:
        groups.append(pat4[:, 2 * PH:, :, :].reshape(-1, K))
    if OW > 2 * PW:
        groups.append(pat4[:, :2 * PH, 2 * PW:, :].reshape(-1, K))
    patches = jnp.concatenate(groups, axis=0)                # (M = N*OH*OW, K)
    M = patches.shape[0]

    # (kh, kw, cin) row order matches the patch column order above.
    w_mat = jnp.transpose(w, (2, 3, 1, 0)).reshape(K, Cout).astype(jnp.float32)

    # Conv bias deliberately unused: BN's batch-mean subtraction cancels it
    # exactly (only rounding-level differences vs. the reference).
    del b
    params = jnp.stack([gamma, beta]).astype(jnp.float32)    # (2, Cout)

    out = pl.pallas_call(
        _fused_conv_bn_pool_lrelu_kernel,
        out_shape=jax.ShapeDtypeStruct((Mp, Cout), jnp.float32),
        grid=(1,),
        in_specs=[
            pl.BlockSpec((M, K), lambda i: (0, 0)),          # full-array block
            pl.BlockSpec((K, Cout), lambda i: (0, 0)),       # full-array block
            pl.BlockSpec((2, Cout), lambda i: (0, 0)),
        ],
        out_specs=pl.BlockSpec((Mp, Cout), lambda i: (0, 0)),
        compiler_params=pltpu.CompilerParams(
            dimension_semantics=("arbitrary",)),
    )(patches, w_mat, params)

    out = out.reshape(N, PH, PW, Cout)
    return jnp.transpose(out, (0, 3, 1, 2))                  # NHWC -> NCHW


def reference(x, w, b, gamma, beta):
    """Pure-JAX reference mirroring the PyTorch forward (training-mode BN)."""
    y = jax.lax.conv_general_dilated(
        x, w, (1, 1), 'VALID', dimension_numbers=('NCHW', 'OIHW', 'NCHW'))
    y = y + b.reshape(1, -1, 1, 1)
    mean = jnp.mean(y, axis=(0, 2, 3), keepdims=True)
    var = jnp.mean((y - mean) ** 2, axis=(0, 2, 3), keepdims=True)
    y = (y - mean) * jax.lax.rsqrt(var + 1e-5)
    y = y * gamma.reshape(1, -1, 1, 1) + beta.reshape(1, -1, 1, 1)
    y = jax.lax.reduce_window(y, -jnp.inf, jax.lax.max,
                              (1, 1, 2, 2), (1, 1, 2, 2), 'VALID')
    return jnp.where(y >= 0, y, 0.01 * y)


if __name__ == "__main__":
    # ConvBlockE(in_channels=4, out_channels=8, kernel_size=5)
    N, Cin, H, W = 2, 4, 16, 16
    Cout, KS = 8, 5

    key = jax.random.PRNGKey(0)
    kx, kw, kb, kg, kbt = jax.random.split(key, 5)

    x = jax.random.normal(kx, (N, Cin, H, W), dtype=jnp.float32)
    bound = 1.0 / np.sqrt(Cin * KS * KS)        # PyTorch-style uniform init
    w = jax.random.uniform(kw, (Cout, Cin, KS, KS), jnp.float32, -bound, bound)
    b = jax.random.uniform(kb, (Cout,), jnp.float32, -bound, bound)
    gamma = jax.random.uniform(kg, (Cout,), jnp.float32, 0.5, 1.5)
    beta = 0.1 * jax.random.normal(kbt, (Cout,), dtype=jnp.float32)

    out = conv_block_e(x, w, b, gamma, beta)
    out = jax.block_until_ready(out)

    ref = jax.block_until_ready(reference(x, w, b, gamma, beta))
    assert out.shape == (N, Cout, (H - KS + 1) // 2, (W - KS + 1) // 2), out.shape
    np.testing.assert_allclose(np.asarray(out), np.asarray(ref),
                               rtol=1e-4, atol=1e-4)
    print("KERNEL_OK")
</pallas_src>

<mosaic_0001>
module attributes {stable_mosaic.version = 11 : i64} {
  func.func @_fused_conv_bn_pool_lrelu_kernel(%arg0: i32, %arg1: memref<288x100xf32, #tpu.memory_space<vmem>>, %arg2: memref<100x8xf32, #tpu.memory_space<vmem>>, %arg3: memref<2x8xf32, #tpu.memory_space<vmem>>, %arg4: memref<72x8xf32, #tpu.memory_space<vmem>>) attributes {dimension_semantics = [#tpu.dimension_semantics<arbitrary>], iteration_bounds = array<i64: 1>, scalar_prefetch = 0 : i64, scratch_operands = 0 : i64, tpu.core_type = #tpu.core_type<tc>, window_params = [{pipeline_mode = #tpu.pipeline_mode<synchronous>, transform_indices = @transform_0, window_bounds = array<i64: 288, 100>}, {pipeline_mode = #tpu.pipeline_mode<synchronous>, transform_indices = @transform_1, window_bounds = array<i64: 100, 8>}, {pipeline_mode = #tpu.pipeline_mode<synchronous>, transform_indices = @transform_2, window_bounds = array<i64: 2, 8>}, {pipeline_mode = #tpu.pipeline_mode<synchronous>, transform_indices = @transform_3, window_bounds = array<i64: 72, 8>}]} {
    %c0 = arith.constant 0 : index
    %c0_0 = arith.constant 0 : index
    %0 = vector.load %arg1[%c0, %c0_0] : memref<288x100xf32, #tpu.memory_space<vmem>>, vector<288x100xf32>
    %c0_1 = arith.constant 0 : index
    %c0_2 = arith.constant 0 : index
    %1 = vector.load %arg2[%c0_1, %c0_2] : memref<100x8xf32, #tpu.memory_space<vmem>>, vector<100x8xf32>
    %cst = arith.constant dense<0.000000e+00> : vector<288x8xf32>
    %2 = tpu.matmul %0, %1, %cst {dimension_numbers = #tpu.dot_dimension_numbers<[1], [0], [0], [1], [0, 0, 1, 1], [], []>} : vector<288x100xf32>, vector<100x8xf32>, vector<288x8xf32> -> vector<288x8xf32>
    %cst_3 = arith.constant dense<0.000000e+00> : vector<8xf32>
    %3 = vector.multi_reduction <add>, %2, %cst_3 [0] : vector<288x8xf32> to vector<8xf32>
    %4 = vector.shape_cast %3 : vector<8xf32> to vector<1x8xf32>
    %cst_4 = arith.constant 0.00347222225 : f32
    %5 = vector.broadcast %cst_4 : f32 to vector<1x8xf32>
    %6 = arith.mulf %4, %5 : vector<1x8xf32>
    %7 = vector.broadcast %6 : vector<1x8xf32> to vector<288x8xf32>
    %8 = arith.subf %2, %7 : vector<288x8xf32>
    %9 = arith.mulf %8, %8 : vector<288x8xf32>
    %cst_5 = arith.constant dense<0.000000e+00> : vector<8xf32>
    %10 = vector.multi_reduction <add>, %9, %cst_5 [0] : vector<288x8xf32> to vector<8xf32>
    %11 = vector.shape_cast %10 : vector<8xf32> to vector<1x8xf32>
    %cst_6 = arith.constant 0.00347222225 : f32
    %12 = vector.broadcast %cst_6 : f32 to vector<1x8xf32>
    %13 = arith.mulf %11, %12 : vector<1x8xf32>
    %cst_7 = arith.constant 9.99999974E-6 : f32
    %14 = vector.broadcast %cst_7 : f32 to vector<1x8xf32>
    %15 = arith.addf %13, %14 : vector<1x8xf32>
    %16 = math.rsqrt %15 : vector<1x8xf32>
    %c0_8 = arith.constant 0 : index
    %c0_9 = arith.constant 0 : index
    %17 = vector.load %arg3[%c0_8, %c0_9] : memref<2x8xf32, #tpu.memory_space<vmem>>, vector<1x8xf32>
    %18 = arith.mulf %16, %17 : vector<1x8xf32>
    %19 = vector.broadcast %18 : vector<1x8xf32> to vector<288x8xf32>
    %20 = arith.mulf %8, %19 : vector<288x8xf32>
    %c1 = arith.constant 1 : index
    %c0_10 = arith.constant 0 : index
    %21 = vector.load %arg3[%c1, %c0_10] : memref<2x8xf32, #tpu.memory_space<vmem>>, vector<1x8xf32>
    %22 = vector.broadcast %21 : vector<1x8xf32> to vector<288x8xf32>
    %23 = arith.addf %20, %22 : vector<288x8xf32>
    %24 = vector.extract_strided_slice %23 {offsets = [0, 0], sizes = [72, 8], strides = [1, 1]} : vector<288x8xf32> to vector<72x8xf32>
    %25 = vector.extract_strided_slice %23 {offsets = [72, 0], sizes = [72, 8], strides = [1, 1]} : vector<288x8xf32> to vector<72x8xf32>
    %26 = arith.maximumf %24, %25 : vector<72x8xf32>
    %27 = vector.extract_strided_slice %23 {offsets = [144, 0], sizes = [72, 8], strides = [1, 1]} : vector<288x8xf32> to vector<72x8xf32>
    %28 = vector.extract_strided_slice %23 {offsets = [216, 0], sizes = [72, 8], strides = [1, 1]} : vector<288x8xf32> to vector<72x8xf32>
    %29 = arith.maximumf %27, %28 : vector<72x8xf32>
    %30 = arith.maximumf %26, %29 : vector<72x8xf32>
    %cst_11 = arith.constant 0.000000e+00 : f32
    %31 = vector.broadcast %cst_11 : f32 to vector<72x8xf32>
    %32 = arith.cmpf oge, %30, %31 : vector<72x8xf32>
    %cst_12 = arith.constant 0.00999999977 : f32
    %33 = vector.broadcast %cst_12 : f32 to vector<72x8xf32>
    %34 = arith.mulf %33, %30 : vector<72x8xf32>
    %35 = arith.select %32, %30, %34 : vector<72x8xi1>, vector<72x8xf32>
    %c0_13 = arith.constant 0 : index
    %c0_14 = arith.constant 0 : index
    %36 = vector.load %arg4[%c0_13, %c0_14] : memref<72x8xf32, #tpu.memory_space<vmem>>, vector<72x8xf32>
    tpu.vector_store %arg4[%c0_13, %c0_14], %35 {strides = array<i32>} : memref<72x8xf32, #tpu.memory_space<vmem>>, vector<72x8xf32>,
    return
  }
  func.func @transform_0(%arg0: i32) -> (i32, i32) {
    %c0_i32 = arith.constant 0 : i32
    %c0_i32_0 = arith.constant 0 : i32
    %c0_i32_1 = arith.constant 0 : i32
    return %c0_i32, %c0_i32_0 : i32, i32
  }
  func.func @transform_1(%arg0: i32) -> (i32, i32) {
    %c0_i32 = arith.constant 0 : i32
    %c0_i32_0 = arith.constant 0 : i32
    %c0_i32_1 = arith.constant 0 : i32
    return %c0_i32, %c0_i32_0 : i32, i32
  }
  func.func @transform_2(%arg0: i32) -> (i32, i32) {
    %c0_i32 = arith.constant 0 : i32
    %c0_i32_0 = arith.constant 0 : i32
    %c0_i32_1 = arith.constant 0 : i32
    return %c0_i32, %c0_i32_0 : i32, i32
  }
  func.func @transform_3(%arg0: i32) -> (i32, i32) {
    %c0_i32 = arith.constant 0 : i32
    %c0_i32_0 = arith.constant 0 : i32
    %c0_i32_1 = arith.constant 0 : i32
    return %c0_i32, %c0_i32_0 : i32, i32
  }
}

</mosaic_0001>

<bundles_post_ra>
// kernel: tpu_custom_call.1
= control target key start
LH: loop header
LB: loop body
LE: loop exit
PB: predicated region body
PF: predicated region fallthrough
CT: control target
= control target key end

     0   :  { %8 = vsyncpa [#allocation3], 0  ;;  %s1037_s12 = smov [#allocation2]   ;;  %s1615_s0 = inlined_call_operand.hbm [shape: f32[288,100], index: 0, kind: input, shape index: {}]   ;;  %s1616_s1 = inlined_call_operand.vmem [shape: f32[100,8], index: 1, kind: input, shape index: {}]   ;;  %s1617_s2 = inlined_call_operand.vmem [shape: f32[2,8], index: 2, kind: input, shape index: {}]   ;;  %s1618_s3 = inlined_call_operand.vmem [shape: f32[72,8], index: 3, kind: output, shape index: {}]  }
   0x1   :  { %s14_s13 = sshll.u32 %s1037_s12, 4  ;;  %s15_s13 = int_to_ptr.vmem [resolvable:$true] %s14_s13 }
   0x2   :  { %s1023_s14 = scalar_lea.vmem %s15_s13, 4608  ;;  %p1028_p1 = scmp.lt.s32.totalorder %s15_s13, %s15_s13 }
   0x3   :  { %p1024_p0 = scmp.ne.s32.totalorder %s15_s13, %s1023_s14  ;;  %p1029_p2 = scmp.lt.s32.totalorder %s1023_s14, %s1023_s14 }
   0x5   :  { %p1030_p3 = por %p1029_p2, %p1028_p1 }
   0x7   :  { %p1031_p4 = pnand %p1030_p3, %p1024_p0 }
   0x9   :  { %1034 = shalt.err (!%p1031_p4)
}
   0xa   :  { %s1038_s15 = smov 128   ;;  %s1039_s16 = smov 8  }
   0xb   :  { %20 = dma.hbm_to_vmem [thread:$0]  %s1615_s0, 4608, %s15_s13, [#allocation3], %s1038_s15, %s1038_s15, %s1039_s16  }
   0xc   :  { %1035 = dma.done.wait [#allocation3], 4608  }
   0xd   :  { %1036 = vsyncadd [#allocation3], 4294962688  ;;  %vm186_vm0 = vcmask 1043456   ;;  %v76_v0 = vld [vmem:[%s1616_s1 + $0x60] sm:$0xf]  ;;  %v75_v1 = vld [vmem:[%s1616_s1 + $0x58] sm:$0xff] }
   0xe   :  { %904 = vmatprep.subr.msk.mxu0 %vm186_vm0, %v76_v0  ;;  %984 = vmatprep.subr.msk.mxu1 %vm186_vm0, %v76_v0  ;;  %v74_v2 = vld [vmem:[%s1616_s1 + $0x50] sm:$0xff]  ;;  %vm77_vm1 = vcmask 818176   ;;  %v73_v3 = vld [vmem:[%s1616_s1 + $0x48] sm:$0xff]  ;;  %v28_v4 = vld [vmem:[#allocation2] sm:$0xff]  ;;  %vm435_vm2 = vcmask 64512  }
   0xf   :  { %905 = vmatpush3.msk.msra.mxu0 %vm186_vm0, %v76_v0  ;;  %997 = vmatpush3.msk.msra.mxu1 %vm186_vm0, %v76_v0  ;;  %v72_v5 = vld [vmem:[%s1616_s1 + $0x40] sm:$0xff]  ;;  %v71_v6 = vld [vmem:[%s1616_s1 + $0x38] sm:$0xff]  ;;  %v70_v7 = vld [vmem:[%s1616_s1 + $0x30] sm:$0xff] }
  0x10   :  { %906 = vmatprep.subr.mxu0 %v75_v1  ;;  %985 = vmatprep.subr.mxu1 %v75_v1  ;;  %v69_v8 = vld [vmem:[%s1616_s1 + $0x28] sm:$0xff]  ;;  %v68_v9 = vld [vmem:[%s1616_s1 + $0x20] sm:$0xff]  ;;  %v67_v10 = vld [vmem:[%s1616_s1 + $0x18] sm:$0xff] }
  0x11   :  { %907 = vmatpush3.msra.mxu0 %v75_v1  ;;  %998 = vmatpush3.msra.mxu1 %v75_v1  ;;  %v66_v11 = vld [vmem:[%s1616_s1 + $0x10] sm:$0xff]  ;;  %v65_v12 = vld [vmem:[%s1616_s1 + $0x8] sm:$0xff]  ;;  %v64_v13 = vld [vmem:[%s1616_s1] sm:$0xff] }
  0x12   :  { %908 = vmatprep.subr.mxu0 %v74_v2  ;;  %930 = vmatprep.mubr.msk.f32.mxu0 %vm77_vm1, %v28_v4  ;;  %v29_v14 = vld [vmem:[#allocation2 + $0x8] sm:$0xff]  ;;  %v30_v15 = vld [vmem:[#allocation2 + $0x10] sm:$0xff]  ;;  %v47_v17 = vld [vmem:[#allocation2 + $0x98] sm:$0xff] }
  0x13   :  { %909 = vmatpush3.msra.mxu0 %v74_v2  ;;  %986 = vmatprep.subr.mxu1 %v74_v2  ;;  %v46_v16 = vld [vmem:[#allocation2 + $0x90] sm:$0xff]  ;;  %v48_v18 = vld [vmem:[#allocation2 + $0xa0] sm:$0xff]  ;;  %v31_v19 = vld [vmem:[#allocation2 + $0x18] sm:$0xff] }
  0x14   :  { %910 = vmatprep.subr.mxu0 %v73_v3  ;;  %999 = vmatpush3.msra.mxu1 %v74_v2  ;;  %v32_v20 = vld [vmem:[#allocation2 + $0x20] sm:$0xff]  ;;  %v49_v21 = vld [vmem:[#allocation2 + $0xa8] sm:$0xff]  ;;  %v50_v22 = vld [vmem:[#allocation2 + $0xb0] sm:$0xff] }
  0x15   :  { %911 = vmatpush3.msra.mxu0 %v73_v3  ;;  %987 = vmatprep.subr.mxu1 %v73_v3  ;;  %v33_v23 = vld [vmem:[#allocation2 + $0x28] sm:$0xff]  ;;  %v34_v24 = vld [vmem:[#allocation2 + $0x30] sm:$0xff]  ;;  %v51_v25 = vld [vmem:[#allocation2 + $0xb8] sm:$0xff] }
  0x16   :  { %912 = vmatprep.subr.mxu0 %v72_v5  ;;  %1000 = vmatpush3.msra.mxu1 %v73_v3  ;;  %v52_v26 = vld [vmem:[#allocation2 + $0xc0] sm:$0xff]  ;;  %v35_v27 = vld [vmem:[#allocation2 + $0x38] sm:$0xff]  ;;  %v53_v29 = vld [vmem:[#allocation2 + $0xc8] sm:$0xff] }
  0x17   :  { %913 = vmatpush3.msra.mxu0 %v72_v5  ;;  %988 = vmatprep.subr.mxu1 %v72_v5  ;;  %v36_v28 = vld [vmem:[#allocation2 + $0x40] sm:$0xff]  ;;  %v54_v30 = vld [vmem:[#allocation2 + $0xd0] sm:$0xff]  ;;  %v37_v31 = vld [vmem:[#allocation2 + $0x48] sm:$0xff] }
  0x18   :  { %914 = vmatprep.subr.mxu0 %v71_v6  ;;  %1001 = vmatpush3.msra.mxu1 %v72_v5  ;;  %v38_v32 = vld [vmem:[#allocation2 + $0x50] sm:$0xff]  ;;  %v55_v33 = vld [vmem:[#allocation2 + $0xd8] sm:$0xff]  ;;  %v56_v34 = vld [vmem:[#allocation2 + $0xe0] sm:$0xff] }
  0x19   :  { %915 = vmatpush3.msra.mxu0 %v71_v6  ;;  %989 = vmatprep.subr.mxu1 %v71_v6  ;;  %v39_v35 = vld [vmem:[#allocation2 + $0x58] sm:$0xff]  ;;  %v40_v36 = vld [vmem:[#allocation2 + $0x60] sm:$0xff]  ;;  %v57_v37 = vld [vmem:[#allocation2 + $0xe8] sm:$0xff] }
  0x1a   :  { %916 = vmatprep.subr.mxu0 %v70_v7  ;;  %1002 = vmatpush3.msra.mxu1 %v71_v6  ;;  %v58_v38 = vld [vmem:[#allocation2 + $0xf0] sm:$0xff]  ;;  %v41_v39 = vld [vmem:[#allocation2 + $0x68] sm:$0xff]  ;;  %v59_v41 = vld [vmem:[#allocation2 + $0xf8] sm:$0xff] }
  0x1b   :  { %917 = vmatpush3.msra.mxu0 %v70_v7  ;;  %990 = vmatprep.subr.mxu1 %v70_v7  ;;  %v42_v40 = vld [vmem:[#allocation2 + $0x70] sm:$0xff]  ;;  %v60_v42 = vld [vmem:[#allocation2 + $0x100] sm:$0xff]  ;;  %v43_v43 = vld [vmem:[#allocation2 + $0x78] sm:$0xff] }
  0x1c   :  { %918 = vmatprep.subr.mxu0 %v69_v8  ;;  %1003 = vmatpush3.msra.mxu1 %v70_v7  ;;  %v44_v44 = vld [vmem:[#allocation2 + $0x80] sm:$0xff]  ;;  %v61_v45 = vld [vmem:[#allocation2 + $0x108] sm:$0xff]  ;;  %v62_v46 = vld [vmem:[#allocation2 + $0x110] sm:$0xff] }
  0x1d   :  { %919 = vmatpush3.msra.mxu0 %v69_v8  ;;  %991 = vmatprep.subr.mxu1 %v69_v8  ;;  %v45_v47 = vld [vmem:[#allocation2 + $0x88] sm:$0xff]  ;;  %v63_v48 = vld [vmem:[#allocation2 + $0x118] sm:$0xff] }
  0x1e   :  { %920 = vmatprep.subr.mxu0 %v68_v9  ;;  %1004 = vmatpush3.msra.mxu1 %v69_v8 }
  0x1f   :  { %921 = vmatpush3.msra.mxu0 %v68_v9  ;;  %992 = vmatprep.subr.mxu1 %v68_v9 }
  0x20   :  { %922 = vmatprep.subr.mxu0 %v67_v10  ;;  %1005 = vmatpush3.msra.mxu1 %v68_v9 }
  0x21   :  { %923 = vmatpush3.msra.mxu0 %v67_v10  ;;  %993 = vmatprep.subr.mxu1 %v67_v10 }
  0x22   :  { %924 = vmatprep.subr.mxu0 %v66_v11  ;;  %1006 = vmatpush3.msra.mxu1 %v67_v10 }
  0x23   :  { %925 = vmatpush3.msra.mxu0 %v66_v11  ;;  %994 = vmatprep.subr.mxu1 %v66_v11 }
  0x24   :  { %926 = vmatprep.subr.mxu0 %v65_v12  ;;  %1007 = vmatpush3.msra.mxu1 %v66_v11 }
  0x25   :  { %927 = vmatpush3.msra.mxu0 %v65_v12  ;;  %995 = vmatprep.subr.mxu1 %v65_v12 }
  0x26   :  { %928 = vmatprep.subr.mxu0 %v64_v13  ;;  %1008 = vmatpush3.msra.mxu1 %v65_v12 }
  0x27   :  { %929 = vmatpush3.msra.mxu0 %v64_v13  ;;  %996 = vmatprep.subr.mxu1 %v64_v13 }
  0x28   :  { %931 = vmatmul.mubr.msk.f32.vlgmr.msra.gmra.mxu0 %vm77_vm1, %v29_v14  ;;  %1009 = vmatpush3.msra.mxu1 %v64_v13 }
  0x29   :  { %933 = vmatprep.mubr.msk.f32.mxu0 %vm77_vm1, %v30_v15  ;;  %957 = vmatprep.mubr.msk.f32.mxu1 %vm77_vm1, %v46_v16 }
  0x2a   :  { %958 = vmatmul.mubr.msk.f32.vlgmr.msra.gmra.mxu1 %vm77_vm1, %v47_v17 }
  0x2b   :  { %960 = vmatprep.mubr.msk.f32.mxu1 %vm77_vm1, %v48_v18 }
  0x2c   :  { %934 = vmatmul.mubr.msk.f32.gmra.mxu0 %vm77_vm1, %v31_v19 }
  0x2d   :  { %936 = vmatprep.mubr.msk.f32.mxu0 %vm77_vm1, %v32_v20 }
  0x2e   :  { %961 = vmatmul.mubr.msk.f32.gmra.mxu1 %vm77_vm1, %v49_v21 }
  0x2f   :  { %963 = vmatprep.mubr.msk.f32.mxu1 %vm77_vm1, %v50_v22 }
  0x30   :  { %937 = vmatmul.mubr.msk.f32.gmra.mxu0 %vm77_vm1, %v33_v23 }
  0x31   :  { %939 = vmatprep.mubr.msk.f32.mxu0 %vm77_vm1, %v34_v24 }
  0x32   :  { %964 = vmatmul.mubr.msk.f32.gmra.mxu1 %vm77_vm1, %v51_v25 }
  0x33   :  { %966 = vmatprep.mubr.msk.f32.mxu1 %vm77_vm1, %v52_v26 }
  0x34   :  { %940 = vmatmul.mubr.msk.f32.gmra.mxu0 %vm77_vm1, %v35_v27 }
  0x35   :  { %942 = vmatprep.mubr.msk.f32.mxu0 %vm77_vm1, %v36_v28 }
  0x36   :  { %967 = vmatmul.mubr.msk.f32.gmra.mxu1 %vm77_vm1, %v53_v29 }
  0x37   :  { %969 = vmatprep.mubr.msk.f32.mxu1 %vm77_vm1, %v54_v30 }
  0x38   :  { %943 = vmatmul.mubr.msk.f32.gmra.mxu0 %vm77_vm1, %v37_v31 }
  0x39   :  { %945 = vmatprep.mubr.msk.f32.mxu0 %vm77_vm1, %v38_v32 }
  0x3a   :  { %970 = vmatmul.mubr.msk.f32.gmra.mxu1 %vm77_vm1, %v55_v33 }
  0x3b   :  { %972 = vmatprep.mubr.msk.f32.mxu1 %vm77_vm1, %v56_v34 }
  0x3c   :  { %946 = vmatmul.mubr.msk.f32.gmra.mxu0 %vm77_vm1, %v39_v35 }
  0x3d   :  { %948 = vmatprep.mubr.msk.f32.mxu0 %vm77_vm1, %v40_v36 }
  0x3e   :  { %973 = vmatmul.mubr.msk.f32.gmra.mxu1 %vm77_vm1, %v57_v37 }
  0x3f   :  { %975 = vmatprep.mubr.msk.f32.mxu1 %vm77_vm1, %v58_v38 }
  0x40   :  { %949 = vmatmul.mubr.msk.f32.gmra.mxu0 %vm77_vm1, %v41_v39 }
  0x41   :  { %951 = vmatprep.mubr.msk.f32.mxu0 %vm77_vm1, %v42_v40 }
  0x42   :  { %976 = vmatmul.mubr.msk.f32.gmra.mxu1 %vm77_vm1, %v59_v41 }
  0x43   :  { %978 = vmatprep.mubr.msk.f32.mxu1 %vm77_vm1, %v60_v42 }
  0x44   :  { %952 = vmatmul.mubr.msk.f32.gmra.mxu0 %vm77_vm1, %v43_v43 }
  0x45   :  { %954 = vmatprep.mubr.msk.f32.mxu0 %vm77_vm1, %v44_v44 }
  0x46   :  { %979 = vmatmul.mubr.msk.f32.gmra.mxu1 %vm77_vm1, %v61_v45 }
  0x47   :  { %981 = vmatprep.mubr.msk.f32.mxu1 %vm77_vm1, %v62_v46 }
  0x48   :  { %955 = vmatmul.mubr.msk.f32.gmra.mxu0 %vm77_vm1, %v45_v47 }
  0x4a   :  { %982 = vmatmul.mubr.msk.f32.gmra.mxu1 %vm77_vm1, %v63_v48 }
  0xe8   :  { %v1138_v49 = vpop.f32.mrf.mxu0 }
  0xe9   :  { %v437_v55 = vsel %vm435_vm2, %v1138_v49, 0.0 }
  0xea   :  { %v1140_v50 = vpop.f32.mrf.mxu0  ;;  %v1142_v51 = vpop.f32.mrf.mxu1 }
  0xeb   :  { %v436_v52 = vsel %vm435_vm2, %v1140_v50, 0.0 }
  0xec   :  { %v1146_v53 = vpop.f32.mrf.mxu0  ;;  %v1148_v54 = vpop.f32.mrf.mxu1  ;;  %v438_v56 = vadd.f32 %v437_v55, %v436_v52 }
  0xed   :  { %v441_v62 = vsel %vm435_vm2, %v1146_v53, 0.0  ;;  %v471_v48 = vsel %vm435_vm2, %v1148_v54, 0.0 }
  0xee   :  { %v1152_v57 = vpop.f32.mrf.mxu0  ;;  %v1158_v61 = vpop.f32.mrf.mxu1 }
  0xef   :  { %v439_v58 = vsel %vm435_vm2, %v1152_v57, 0.0 }
  0xf0   :  { %v440_v59 = vadd.f32 %v439_v58, %v438_v56  ;;  %v1156_v60 = vpop.f32.mrf.mxu0  ;;  %v1168_v4 = vpop.f32.mrf.mxu1  ;;  %v473_v56 = vsel %vm435_vm2, %v1142_v51, 0.0 }
  0xf1   :  { %v445_v5 = vsel %vm435_vm2, %v1156_v60, 0.0 }
  0xf2   :  { %v1162_v63 = vpop.f32.mrf.mxu0  ;;  %v442_v0 = vadd.f32 %v441_v62, %v440_v59  ;;  %v1178_v11 = vpop.f32.mrf.mxu1  ;;  %v475_v59 = vsel %vm435_vm2, %v1168_v4, 0.0 }
  0xf3   :  { %v443_v1 = vsel %vm435_vm2, %v1162_v63, 0.0 }
  0xf4   :  { %v444_v2 = vadd.f32 %v443_v1, %v442_v0  ;;  %v1166_v3 = vpop.f32.mrf.mxu0  ;;  %v1188_v18 = vpop.f32.mrf.mxu1  ;;  %v477_v1 = vsel %vm435_vm2, %v1158_v61, 0.0 }
  0xf5   :  { %v449_v12 = vsel %vm435_vm2, %v1166_v3, 0.0 }
  0xf6   :  { %v1172_v6 = vpop.f32.mrf.mxu0  ;;  %v446_v7 = vadd.f32 %v445_v5, %v444_v2  ;;  %v1198_v25 = vpop.f32.mrf.mxu1  ;;  %v479_v5 = vsel %vm435_vm2, %v1188_v18, 0.0 }
  0xf7   :  { %v447_v8 = vsel %vm435_vm2, %v1172_v6, 0.0 }
  0xf8   :  { %v448_v9 = vadd.f32 %v447_v8, %v446_v7  ;;  %v1176_v10 = vpop.f32.mrf.mxu0  ;;  %v1208_v32 = vpop.f32.mrf.mxu1 }
  0xf9   :  { %v453_v19 = vsel %vm435_vm2, %v1176_v10, 0.0 }
  0xfa   :  { %v1182_v13 = vpop.f32.mrf.mxu0  ;;  %v450_v14 = vadd.f32 %v449_v12, %v448_v9  ;;  %v1218_v39 = vpop.f32.mrf.mxu1  ;;  %v481_v9 = vsel %vm435_vm2, %v1178_v11, 0.0 }
  0xfb   :  { %v451_v15 = vsel %vm435_vm2, %v1182_v13, 0.0 }
  0xfc   :  { %v452_v16 = vadd.f32 %v451_v15, %v450_v14  ;;  %v1186_v17 = vpop.f32.mrf.mxu0  ;;  %v1226_v45 = vpop.f32.mrf.mxu1  ;;  %v483_v14 = vsel %vm435_vm2, %v1208_v32, 0.0 }
  0xfd   :  { %v457_v26 = vsel %vm435_vm2, %v1186_v17, 0.0 }
  0xfe   :  { %v1192_v20 = vpop.f32.mrf.mxu0  ;;  %v454_v21 = vadd.f32 %v453_v19, %v452_v16  ;;  %v1232_v55 = vpop.f32.mrf.mxu1  ;;  %v485_v19 = vsel %vm435_vm2, %v1198_v25, 0.0 }
  0xff   :  { %v455_v22 = vsel %vm435_vm2, %v1192_v20, 0.0 }
 0x100   :  { %v456_v23 = vadd.f32 %v455_v22, %v454_v21  ;;  %v1196_v24 = vpop.f32.mrf.mxu0  ;;  %v1238_v0 = vpop.f32.mrf.mxu1  ;;  %v487_v22 = vsel %vm435_vm2, %v1226_v45, 0.0 }
 0x101   :  { %v461_v33 = vsel %vm435_vm2, %v1196_v24, 0.0 }
 0x102   :  { %v1202_v27 = vpop.f32.mrf.mxu0  ;;  %v458_v28 = vadd.f32 %v457_v26, %v456_v23  ;;  %v1244_v8 = vpop.f32.mrf.mxu1 }
 0x103   :  { %v459_v29 = vsel %vm435_vm2, %v1202_v27, 0.0 }
 0x104   :  { %v460_v30 = vadd.f32 %v459_v29, %v458_v28  ;;  %v1206_v31 = vpop.f32.mrf.mxu0  ;;  %v1250_v16 = vpop.f32.mrf.mxu1  ;;  %v489_v28 = vsel %vm435_vm2, %v1218_v39, 0.0 }
 0x105   :  { %v465_v40 = vsel %vm435_vm2, %v1206_v31, 0.0 }
 0x106   :  { %v1212_v34 = vpop.f32.mrf.mxu0  ;;  %v462_v35 = vadd.f32 %v461_v33, %v460_v30  ;;  %v1256_v26 = vpop.f32.mrf.mxu1  ;;  %v491_v30 = vsel %vm435_vm2, %v1238_v0, 0.0 }
 0x107   :  { %v463_v36 = vsel %vm435_vm2, %v1212_v34, 0.0 }
 0x108   :  { %v464_v37 = vadd.f32 %v463_v36, %v462_v35  ;;  %v1216_v38 = vpop.f32.mrf.mxu0  ;;  %v1262_v35 = vpop.f32.mrf.mxu1  ;;  %v493_v36 = vsel %vm435_vm2, %v1232_v55, 0.0 }
 0x109   :  { %v469_v46 = vsel %vm435_vm2, %v1216_v38, 0.0 }
 0x10a   :  { %v1222_v41 = vpop.f32.mrf.mxu0  ;;  %v466_v42 = vadd.f32 %v465_v40, %v464_v37  ;;  %v495_v40 = vsel %vm435_vm2, %v1250_v16, 0.0 }
 0x10b   :  { %v467_v43 = vsel %vm435_vm2, %v1222_v41, 0.0 }
 0x10c   :  { %v468_v44 = vadd.f32 %v467_v43, %v466_v42  ;;  %v983_v43 = vpop.f32.mrf.mxu1 }
 0x10e   :  { %v470_v47 = vadd.f32 %v469_v46, %v468_v44  ;;  %v497_v44 = vsel %vm435_vm2, %v1244_v8, 0.0 }
 0x110   :  { %v472_v52 = vadd.f32 %v471_v48, %v470_v47  ;;  %v499_v47 = vsel %vm435_vm2, %v1262_v35, 0.0 }
 0x112   :  { %v474_v58 = vadd.f32 %v473_v56, %v472_v52  ;;  %v426_v52 = vpop.f32.mrf.mxu1  ;;  %v501_v56 = vsel %vm435_vm2, %v1256_v26, 0.0 }
 0x114   :  { %v476_v62 = vadd.f32 %v475_v59, %v474_v58  ;;  %v503_v59 = vsel %vm435_vm2, %v426_v52, 0.0 }
 0x116   :  { %v478_v2 = vadd.f32 %v477_v1, %v476_v62  ;;  %v505_v1 = vsel %vm435_vm2, %v983_v43, 0.0 }
 0x118   :  { %v480_v7 = vadd.f32 %v479_v5, %v478_v2 }
 0x11a   :  { %v482_v12 = vadd.f32 %v481_v9, %v480_v7 }
 0x11c   :  { %v484_v15 = vadd.f32 %v483_v14, %v482_v12 }
 0x11e   :  { %v486_v21 = vadd.f32 %v485_v19, %v484_v15 }
 0x120   :  { %v488_v23 = vadd.f32 %v487_v22, %v486_v21 }
 0x122   :  { %v490_v29 = vadd.f32 %v489_v28, %v488_v23 }
 0x124   :  { %v492_v33 = vadd.f32 %v491_v30, %v490_v29 }
 0x126   :  { %v494_v37 = vadd.f32 %v493_v36, %v492_v33 }
 0x128   :  { %v496_v42 = vadd.f32 %v495_v40, %v494_v37 }
 0x12a   :  { %v498_v46 = vadd.f32 %v497_v44, %v496_v42 }
 0x12c   :  { %v500_v48 = vadd.f32 %v499_v47, %v498_v46 }
 0x12e   :  { %v502_v58 = vadd.f32 %v501_v56, %v500_v48 }
 0x130   :  { %v504_v62 = vadd.f32 %v503_v59, %v502_v58 }
 0x132   :  { %v506_v2 = vadd.f32 %v505_v1, %v504_v62 }
 0x134   :  { %v507_v5 = vrot.slane %v506_v2, 4 }
 0x136   :  { %v508_v7 = vadd.f32 %v507_v5, %v506_v2 }
 0x138   :  { %v509_v9 = vrot.slane %v508_v7, 2 }
 0x13a   :  { %v510_v12 = vadd.f32 %v509_v9, %v508_v7 }
 0x13c   :  { %v511_v14 = vrot.slane %v510_v12, 1 }
 0x13e   :  { %v512_v15 = vadd.f32 %v511_v14, %v510_v12 }
 0x140   :  { %v1276_v19 = vmul.f32 0.0034722222, %v512_v15 }
 0x142   :  { %v1279_v21 = vsub.f32 %v426_v52, %v1276_v19  ;;  %v1282_v22 = vsub.f32 %v983_v43, %v1276_v19  ;;  %v1286_v23 = vsub.f32 %v1140_v50, %v1276_v19  ;;  %v1290_v28 = vsub.f32 %v1138_v49, %v1276_v19 }
 0x143   :  { %v1294_v29 = vsub.f32 %v1152_v57, %v1276_v19  ;;  %v1298_v30 = vsub.f32 %v1146_v53, %v1276_v19  ;;  %v1306_v50 = vsub.f32 %v1162_v63, %v1276_v19  ;;  %v1312_v57 = vsub.f32 %v1156_v60, %v1276_v19 }
 0x144   :  { %v550_v33 = vmul.f32 %v1286_v23, %v1286_v23  ;;  %v551_v36 = vmul.f32 %v1290_v28, %v1290_v28  ;;  %v1320_v43 = vsub.f32 %v1172_v6, %v1276_v19  ;;  %v1327_v60 = vsub.f32 %v1166_v3, %v1276_v19 }
 0x145   :  { %v552_v49 = vmul.f32 %v1294_v29, %v1294_v29  ;;  %v553_v53 = vmul.f32 %v1298_v30, %v1298_v30  ;;  %v554_v63 = vmul.f32 %v1306_v50, %v1306_v50  ;;  %v555_v47 = vmul.f32 %v1312_v57, %v1312_v57 }
 0x146   :  { %v586_v37 = vsel %vm435_vm2, %v550_v33, 0.0  ;;  %v587_v40 = vsel %vm435_vm2, %v551_v36, 0.0  ;;  %v1334_v6 = vsub.f32 %v1182_v13, %v1276_v19  ;;  %v556_v56 = vmul.f32 %v1320_v43, %v1320_v43 }
 0x147   :  { %v588_v42 = vadd.f32 %v587_v40, %v586_v37  ;;  %v589_v44 = vsel %vm435_vm2, %v552_v49, 0.0  ;;  %v591_v48 = vsel %vm435_vm2, %v553_v53, 0.0  ;;  %v593_v58 = vsel %vm435_vm2, %v554_v63, 0.0 }
 0x148   :  { %v1341_v3 = vsub.f32 %v1176_v10, %v1276_v19  ;;  %v557_v62 = vmul.f32 %v1327_v60, %v1327_v60  ;;  %v595_v1 = vsel %vm435_vm2, %v555_v47, 0.0  ;;  %v1348_v13 = vsub.f32 %v1192_v20, %v1276_v19 }
 0x149   :  { %v590_v46 = vadd.f32 %v589_v44, %v588_v42  ;;  %v558_v5 = vmul.f32 %v1334_v6, %v1334_v6  ;;  %v597_v7 = vsel %vm435_vm2, %v556_v56, 0.0  ;;  %v1355_v10 = vsub.f32 %v1186_v17, %v1276_v19 }
 0x14a   :  { %v559_v12 = vmul.f32 %v1341_v3, %v1341_v3  ;;  %v599_v14 = vsel %vm435_vm2, %v557_v62, 0.0  ;;  %v1362_v20 = vsub.f32 %v1202_v27, %v1276_v19  ;;  %v560_v33 = vmul.f32 %v1348_v13, %v1348_v13 }
 0x14b   :  { %v592_v52 = vadd.f32 %v591_v48, %v590_v46  ;;  %v601_v36 = vsel %vm435_vm2, %v558_v5, 0.0  ;;  %v1369_v17 = vsub.f32 %v1196_v24, %v1276_v19  ;;  %v561_v53 = vmul.f32 %v1355_v10, %v1355_v10 }
 0x14c   :  { %v603_v37 = vsel %vm435_vm2, %v559_v12, 0.0  ;;  %v1376_v27 = vsub.f32 %v1212_v34, %v1276_v19  ;;  %v562_v42 = vmul.f32 %v1362_v20, %v1362_v20  ;;  %v605_v63 = vsel %vm435_vm2, %v560_v33, 0.0 }
 0x14d   :  { %v594_v59 = vadd.f32 %v593_v58, %v592_v52  ;;  %v1383_v24 = vsub.f32 %v1206_v31, %v1276_v19  ;;  %v563_v46 = vmul.f32 %v1369_v17, %v1369_v17  ;;  %v607_v47 = vsel %vm435_vm2, %v561_v53, 0.0 }
 0x14e   :  { %v1390_v34 = vsub.f32 %v1222_v41, %v1276_v19  ;;  %v564_v52 = vmul.f32 %v1376_v27, %v1376_v27  ;;  %v609_v56 = vsel %vm435_vm2, %v562_v42, 0.0  ;;  %v1397_v31 = vsub.f32 %v1216_v38, %v1276_v19 }
 0x14f   :  { %v596_v2 = vadd.f32 %v595_v1, %v594_v59  ;;  %v565_v59 = vmul.f32 %v1383_v24, %v1383_v24  ;;  %v611_v62 = vsel %vm435_vm2, %v563_v46, 0.0  ;;  %v1404_v41 = vsub.f32 %v1148_v54, %v1276_v19 }
 0x150   :  { %v613_v5 = vsel %vm435_vm2, %v564_v52, 0.0  ;;  %v1411_v38 = vsub.f32 %v1142_v51, %v1276_v19  ;;  %v1418_v54 = vsub.f32 %v1168_v4, %v1276_v19  ;;  %v1425_v51 = vsub.f32 %v1158_v61, %v1276_v19 }
 0x151   :  { %v598_v9 = vadd.f32 %v597_v7, %v596_v2  ;;  %v566_v2 = vmul.f32 %v1390_v34, %v1390_v34  ;;  %v615_v12 = vsel %vm435_vm2, %v565_v59, 0.0  ;;  %v1432_v4 = vsub.f32 %v1188_v18, %v1276_v19 }
 0x152   :  { %v1439_v61 = vsub.f32 %v1178_v11, %v1276_v19  ;;  %v1446_v18 = vsub.f32 %v1208_v32, %v1276_v19  ;;  %v1453_v11 = vsub.f32 %v1198_v25, %v1276_v19  ;;  %v1460_v32 = vsub.f32 %v1226_v45, %v1276_v19 }
 0x153   :  { %v600_v15 = vadd.f32 %v599_v14, %v598_v9  ;;  %v567_v9 = vmul.f32 %v1397_v31, %v1397_v31  ;;  %v617_v33 = vsel %vm435_vm2, %v566_v2, 0.0  ;;  %v1467_v25 = vsub.f32 %v1218_v39, %v1276_v19 }
 0x154   :  { %v1474_v45 = vsub.f32 %v1238_v0, %v1276_v19  ;;  %v1481_v39 = vsub.f32 %v1232_v55, %v1276_v19  ;;  %v1488_v0 = vsub.f32 %v1250_v16, %v1276_v19  ;;  %v1495_v55 = vsub.f32 %v1244_v8, %v1276_v19 }
 0x155   :  { %v602_v49 = vadd.f32 %v601_v36, %v600_v15  ;;  %v568_v15 = vmul.f32 %v1404_v41, %v1404_v41  ;;  %v619_v53 = vsel %vm435_vm2, %v567_v9, 0.0  ;;  %v1502_v16 = vsub.f32 %v1262_v35, %v1276_v19 }
 0x156   :  { %v1509_v8 = vsub.f32 %v1256_v26, %v1276_v19  ;;  %v584_v26 = vmul.f32 %v1279_v21, %v1279_v21 }
 0x157   :  { %v604_v40 = vadd.f32 %v603_v37, %v602_v49  ;;  %v569_v49 = vmul.f32 %v1411_v38, %v1411_v38  ;;  %v621_v42 = vsel %vm435_vm2, %v568_v15, 0.0  ;;  %v582_v35 = vmul.f32 %v1502_v16, %v1502_v16 }
 0x159   :  { %v606_v44 = vadd.f32 %v605_v63, %v604_v40  ;;  %v570_v40 = vmul.f32 %v1418_v54, %v1418_v54  ;;  %v623_v46 = vsel %vm435_vm2, %v569_v49, 0.0  ;;  %v649_v19 = vsel %vm435_vm2, %v582_v35, 0.0 }
 0x15b   :  { %v608_v48 = vadd.f32 %v607_v47, %v606_v44  ;;  %v571_v44 = vmul.f32 %v1425_v51, %v1425_v51  ;;  %v625_v52 = vsel %vm435_vm2, %v570_v40, 0.0 }
 0x15d   :  { %v610_v58 = vadd.f32 %v609_v56, %v608_v48  ;;  %v572_v48 = vmul.f32 %v1432_v4, %v1432_v4  ;;  %v627_v59 = vsel %vm435_vm2, %v571_v44, 0.0 }
 0x15f   :  { %v612_v1 = vadd.f32 %v611_v62, %v610_v58  ;;  %v573_v58 = vmul.f32 %v1439_v61, %v1439_v61  ;;  %v629_v2 = vsel %vm435_vm2, %v572_v48, 0.0 }
 0x161   :  { %v614_v7 = vadd.f32 %v613_v5, %v612_v1  ;;  %v574_v1 = vmul.f32 %v1446_v18, %v1446_v18  ;;  %v631_v9 = vsel %vm435_vm2, %v573_v58, 0.0 }
 0x163   :  { %v616_v14 = vadd.f32 %v615_v12, %v614_v7  ;;  %v575_v7 = vmul.f32 %v1453_v11, %v1453_v11  ;;  %v633_v15 = vsel %vm435_vm2, %v574_v1, 0.0 }
 0x165   :  { %v618_v36 = vadd.f32 %v617_v33, %v616_v14  ;;  %v576_v14 = vmul.f32 %v1460_v32, %v1460_v32  ;;  %v635_v49 = vsel %vm435_vm2, %v575_v7, 0.0 }
 0x167   :  { %v620_v37 = vadd.f32 %v619_v53, %v618_v36  ;;  %v577_v36 = vmul.f32 %v1467_v25, %v1467_v25  ;;  %v637_v40 = vsel %vm435_vm2, %v576_v14, 0.0 }
 0x169   :  { %v622_v63 = vadd.f32 %v621_v42, %v620_v37  ;;  %v578_v37 = vmul.f32 %v1474_v45, %v1474_v45  ;;  %v639_v44 = vsel %vm435_vm2, %v577_v36, 0.0 }
 0x16b   :  { %v624_v47 = vadd.f32 %v623_v46, %v622_v63  ;;  %v579_v63 = vmul.f32 %v1481_v39, %v1481_v39  ;;  %v641_v48 = vsel %vm435_vm2, %v578_v37, 0.0 }
 0x16d   :  { %v626_v56 = vadd.f32 %v625_v52, %v624_v47  ;;  %v580_v47 = vmul.f32 %v1488_v0, %v1488_v0  ;;  %v643_v58 = vsel %vm435_vm2, %v579_v63, 0.0 }
 0x16f   :  { %v628_v62 = vadd.f32 %v627_v59, %v626_v56  ;;  %v581_v56 = vmul.f32 %v1495_v55, %v1495_v55 }
 0x171   :  { %v630_v5 = vadd.f32 %v629_v2, %v628_v62  ;;  %v645_v62 = vsel %vm435_vm2, %v580_v47, 0.0  ;;  %v583_v2 = vmul.f32 %v1509_v8, %v1509_v8 }
 0x173   :  { %v632_v12 = vadd.f32 %v631_v9, %v630_v5  ;;  %v647_v5 = vsel %vm435_vm2, %v581_v56, 0.0  ;;  %v651_v14 = vsel %vm435_vm2, %v583_v2, 0.0 }
 0x175   :  { %v634_v33 = vadd.f32 %v633_v15, %v632_v12  ;;  %v585_v12 = vmul.f32 %v1282_v22, %v1282_v22 }
 0x177   :  { %v636_v53 = vadd.f32 %v635_v49, %v634_v33  ;;  %v653_v33 = vsel %vm435_vm2, %v584_v26, 0.0  ;;  %v655_v49 = vsel %vm435_vm2, %v585_v12, 0.0 }
 0x179   :  { %v638_v42 = vadd.f32 %v637_v40, %v636_v53 }
 0x17b   :  { %v640_v46 = vadd.f32 %v639_v44, %v638_v42 }
 0x17d   :  { %v642_v52 = vadd.f32 %v641_v48, %v640_v46 }
 0x17f   :  { %v644_v59 = vadd.f32 %v643_v58, %v642_v52  ;;  %v668_v52 = vlaneseq  ;;  %v666_v58 = vld [vmem:[%s1617_s2] sm:$0x1] }
 0x181   :  { %v646_v1 = vadd.f32 %v645_v62, %v644_v59  ;;  %v669_v56 = vshrl.u32 %v668_v52, 7 }
 0x183   :  { %v648_v7 = vadd.f32 %v647_v5, %v646_v1  ;;  %v670_v59 = vsub.s32 0, %v669_v56 }
 0x185   :  { %v650_v9 = vadd.f32 %v649_v19, %v648_v7 }
 0x187   :  { %v652_v15 = vadd.f32 %v651_v14, %v650_v9 }
 0x189   :  { %v654_v36 = vadd.f32 %v653_v33, %v652_v15 }
 0x18b   :  { %v656_v53 = vadd.f32 %v655_v49, %v654_v36 }
 0x18d   :  { %v657_v37 = vrot.slane %v656_v53, 4 }
 0x18f   :  { %v658_v40 = vadd.f32 %v657_v37, %v656_v53 }
 0x191   :  { %v659_v42 = vrot.slane %v658_v40, 2 }
 0x193   :  { %v660_v63 = vadd.f32 %v659_v42, %v658_v40 }
 0x195   :  { %v661_v44 = vrot.slane %v660_v63, 1 }
 0x197   :  { %v662_v46 = vadd.f32 %v661_v44, %v660_v63 }
 0x199   :  { %v663_v47 = vmul.f32 0.0034722222, %v662_v46 }
 0x19b   :  { %v664_v48 = vadd.f32 1e-05, %v663_v47 }
 0x19d   :  { %1013 = vrsqrt.f32 %v664_v48 }
 0x1aa   :  { %v1014_v35 = vpop.eup %1013 }
 0x1ab   :  { %v667_v62 = vmul.f32 %v1014_v35, %v666_v58 }
 0x1ad   :  { %v671_v1 = vrot.slane %v667_v62, %v670_v59 }
 0x1af   :  { %v672_v2 = vmul.f32 %v671_v1, %v1286_v23  ;;  %v673_v5 = vmul.f32 %v671_v1, %v1290_v28  ;;  %v674_v7 = vmul.f32 %v671_v1, %v1294_v29  ;;  %v675_v26 = vmul.f32 %v671_v1, %v1298_v30 }
 0x1b0   :  { %v676_v19 = vmul.f32 %v671_v1, %v1306_v50  ;;  %v677_v9 = vmul.f32 %v671_v1, %v1312_v57  ;;  %v678_v12 = vmul.f32 %v671_v1, %v1320_v43  ;;  %v679_v14 = vmul.f32 %v671_v1, %v1327_v60 }
 0x1b1   :  { %v680_v15 = vmul.f32 %v671_v1, %v1334_v6  ;;  %v681_v33 = vmul.f32 %v671_v1, %v1341_v3  ;;  %v682_v23 = vmul.f32 %v671_v1, %v1348_v13  ;;  %v683_v28 = vmul.f32 %v671_v1, %v1355_v10 }
 0x1b2   :  { %v684_v29 = vmul.f32 %v671_v1, %v1362_v20  ;;  %v685_v30 = vmul.f32 %v671_v1, %v1369_v17  ;;  %v686_v50 = vmul.f32 %v671_v1, %v1376_v27  ;;  %v687_v57 = vmul.f32 %v671_v1, %v1383_v24 }
 0x1b3   :  { %v688_v43 = vmul.f32 %v671_v1, %v1390_v34  ;;  %v689_v60 = vmul.f32 %v671_v1, %v1397_v31  ;;  %v690_v6 = vmul.f32 %v671_v1, %v1404_v41  ;;  %v691_v3 = vmul.f32 %v671_v1, %v1411_v38  ;;  %v854_v41 = vld [vmem:[%s1617_s2 + $0x1] ss:$0 sm:$0xff] }
 0x1b4   :  { %v692_v13 = vmul.f32 %v671_v1, %v1418_v54  ;;  %v693_v10 = vmul.f32 %v671_v1, %v1425_v51  ;;  %v694_v20 = vmul.f32 %v671_v1, %v1432_v4  ;;  %v695_v17 = vmul.f32 %v671_v1, %v1439_v61 }
 0x1b5   :  { %v696_v27 = vmul.f32 %v671_v1, %v1446_v18  ;;  %v697_v24 = vmul.f32 %v671_v1, %v1453_v11  ;;  %v698_v34 = vmul.f32 %v671_v1, %v1460_v32  ;;  %v699_v31 = vmul.f32 %v671_v1, %v1467_v25 }
 0x1b6   :  { %v700_v38 = vmul.f32 %v671_v1, %v1474_v45  ;;  %v701_v54 = vmul.f32 %v671_v1, %v1481_v39  ;;  %v702_v51 = vmul.f32 %v671_v1, %v1488_v0  ;;  %v703_v4 = vmul.f32 %v671_v1, %v1495_v55 }
 0x1b7   :  { %v704_v61 = vmul.f32 %v671_v1, %v1502_v16  ;;  %v705_v18 = vmul.f32 %v671_v1, %v1509_v8  ;;  %v706_v11 = vmul.f32 %v671_v1, %v1279_v21  ;;  %v707_v32 = vmul.f32 %v671_v1, %v1282_v22 }
 0x1b8   :  { %v713_v25 = vadd.f32 %v854_v41, %v672_v2  ;;  %v714_v36 = vadd.f32 %v854_v41, %v673_v5  ;;  %v715_v49 = vadd.f32 %v854_v41, %v674_v7  ;;  %v716_v53 = vadd.f32 %v854_v41, %v675_v26 }
 0x1b9   :  { %v717_v37 = vadd.f32 %v854_v41, %v676_v19  ;;  %v718_v45 = vadd.f32 %v854_v41, %v677_v9  ;;  %v719_v40 = vadd.f32 %v854_v41, %v678_v12  ;;  %v720_v39 = vadd.f32 %v854_v41, %v679_v14 }
 0x1ba   :  { %v721_v42 = vadd.f32 %v854_v41, %v680_v15  ;;  %v722_v0 = vadd.f32 %v854_v41, %v681_v33  ;;  %v723_v63 = vadd.f32 %v854_v41, %v682_v23  ;;  %v724_v55 = vadd.f32 %v854_v41, %v683_v28 }
 0x1bb   :  { %v725_v44 = vadd.f32 %v854_v41, %v684_v29  ;;  %v726_v16 = vadd.f32 %v854_v41, %v685_v30  ;;  %v727_v46 = vadd.f32 %v854_v41, %v686_v50  ;;  %v728_v8 = vadd.f32 %v854_v41, %v687_v57 }
 0x1bc   :  { %v729_v47 = vadd.f32 %v854_v41, %v688_v43  ;;  %v730_v21 = vadd.f32 %v854_v41, %v689_v60  ;;  %v731_v48 = vadd.f32 %v854_v41, %v690_v6  ;;  %v732_v22 = vadd.f32 %v854_v41, %v691_v3 }
 0x1bd   :  { %v733_v52 = vadd.f32 %v854_v41, %v692_v13  ;;  %v734_v56 = vadd.f32 %v854_v41, %v693_v10  ;;  %v735_v58 = vadd.f32 %v854_v41, %v694_v20  ;;  %v736_v59 = vadd.f32 %v854_v41, %v695_v17 }
 0x1be   :  { %v737_v35 = vadd.f32 %v854_v41, %v696_v27  ;;  %v738_v62 = vadd.f32 %v854_v41, %v697_v24  ;;  %v739_v1 = vadd.f32 %v854_v41, %v698_v34  ;;  %v740_v2 = vadd.f32 %v854_v41, %v699_v31 }
 0x1bf   :  { %v741_v5 = vadd.f32 %v854_v41, %v700_v38  ;;  %v742_v7 = vadd.f32 %v854_v41, %v701_v54  ;;  %v743_v26 = vadd.f32 %v854_v41, %v702_v51  ;;  %v744_v19 = vadd.f32 %v854_v41, %v703_v4 }
 0x1c0   :  { %v745_v9 = vadd.f32 %v854_v41, %v704_v61  ;;  %v746_v12 = vadd.f32 %v854_v41, %v705_v18  ;;  %v747_v14 = vadd.f32 %v854_v41, %v706_v11  ;;  %v748_v15 = vadd.f32 %v854_v41, %v707_v32 }
 0x1c1   :  { %v749_v33 = vmax.f32 %v713_v25, %v722_v0  ;;  %v750_v23 = vmax.f32 %v714_v36, %v723_v63  ;;  %v751_v28 = vmax.f32 %v715_v49, %v724_v55  ;;  %v752_v29 = vmax.f32 %v716_v53, %v725_v44 }
 0x1c2   :  { %v753_v30 = vmax.f32 %v717_v37, %v726_v16  ;;  %v754_v50 = vmax.f32 %v718_v45, %v727_v46  ;;  %v755_v57 = vmax.f32 %v719_v40, %v728_v8  ;;  %v756_v43 = vmax.f32 %v720_v39, %v729_v47 }
 0x1c3   :  { %v757_v60 = vmax.f32 %v721_v42, %v730_v21  ;;  %v758_v6 = vmax.f32 %v731_v48, %v740_v2  ;;  %v759_v3 = vmax.f32 %v732_v22, %v741_v5  ;;  %v760_v13 = vmax.f32 %v733_v52, %v742_v7 }
 0x1c4   :  { %v761_v10 = vmax.f32 %v734_v56, %v743_v26  ;;  %v762_v20 = vmax.f32 %v735_v58, %v744_v19  ;;  %v763_v17 = vmax.f32 %v736_v59, %v745_v9  ;;  %v764_v27 = vmax.f32 %v737_v35, %v746_v12 }
 0x1c5   :  { %v765_v24 = vmax.f32 %v738_v62, %v747_v14  ;;  %v766_v34 = vmax.f32 %v739_v1, %v748_v15  ;;  %v767_v31 = vmax.f32 %v749_v33, %v758_v6  ;;  %v768_v41 = vmax.f32 %v750_v23, %v759_v3 }
 0x1c6   :  { %v769_v38 = vmax.f32 %v751_v28, %v760_v13  ;;  %v770_v54 = vmax.f32 %v752_v29, %v761_v10  ;;  %v771_v51 = vmax.f32 %v753_v30, %v762_v20  ;;  %v772_v4 = vmax.f32 %v754_v50, %v763_v17 }
 0x1c7   :  { %v773_v61 = vmax.f32 %v755_v57, %v764_v27  ;;  %v774_v18 = vmax.f32 %v756_v43, %v765_v24  ;;  %v775_v11 = vmax.f32 %v757_v60, %v766_v34  ;;  %vm776_vm3 = vcmp.ge.f32.partialorder %v767_v31, 0.0 }
 0x1c8   :  { %vm777_vm4 = vcmp.ge.f32.partialorder %v768_v41, 0.0  ;;  %vm778_vm5 = vcmp.ge.f32.partialorder %v769_v38, 0.0  ;;  %vm779_vm6 = vcmp.ge.f32.partialorder %v770_v54, 0.0  ;;  %vm780_vm7 = vcmp.ge.f32.partialorder %v771_v51, 0.0 }
 0x1c9   :  { %vm781_vm8 = vcmp.ge.f32.partialorder %v772_v4, 0.0  ;;  %vm782_vm9 = vcmp.ge.f32.partialorder %v773_v61, 0.0  ;;  %vm783_vm10 = vcmp.ge.f32.partialorder %v774_v18, 0.0  ;;  %vm784_vm11 = vcmp.ge.f32.partialorder %v775_v11, 0.0 }
 0x1ca   :  { %v785_v32 = vmul.f32 0.01, %v767_v31  ;;  %v786_v25 = vmul.f32 0.01, %v768_v41  ;;  %v787_v36 = vmul.f32 0.01, %v769_v38 }
 0x1cb   :  { %v788_v49 = vmul.f32 0.01, %v770_v54  ;;  %v789_v53 = vmul.f32 0.01, %v771_v51  ;;  %v790_v37 = vmul.f32 0.01, %v772_v4 }
 0x1cc   :  { %v791_v45 = vmul.f32 0.01, %v773_v61  ;;  %v792_v40 = vmul.f32 0.01, %v774_v18  ;;  %v793_v39 = vmul.f32 0.01, %v775_v11  ;;  %v794_v42 = vsel %vm776_vm3, %v767_v31, %v785_v32 }
 0x1cd   :  { %v795_v0 = vsel %vm777_vm4, %v768_v41, %v786_v25  ;;  %v796_v63 = vsel %vm778_vm5, %v769_v38, %v787_v36  ;;  %v797_v55 = vsel %vm779_vm6, %v770_v54, %v788_v49  ;;  %v798_v44 = vsel %vm780_vm7, %v771_v51, %v789_v53  ;;  %803 = vst.msk [vmem:[%s1618_s3] sm:$0xff] %vm435_vm2, %v794_v42 }
 0x1ce   :  { %v799_v16 = vsel %vm781_vm8, %v772_v4, %v790_v37  ;;  %v800_v46 = vsel %vm782_vm9, %v773_v61, %v791_v45  ;;  %v801_v8 = vsel %vm783_vm10, %v774_v18, %v792_v40  ;;  %v802_v47 = vsel %vm784_vm11, %v775_v11, %v793_v39  ;;  %804 = vst.msk [vmem:[%s1618_s3 + $0x8] sm:$0xff] %vm435_vm2, %v795_v0 }
 0x1cf   :  { %805 = vst.msk [vmem:[%s1618_s3 + $0x10] sm:$0xff] %vm435_vm2, %v796_v63  ;;  %806 = vst.msk [vmem:[%s1618_s3 + $0x18] sm:$0xff] %vm435_vm2, %v797_v55 }
 0x1d0   :  { %807 = vst.msk [vmem:[%s1618_s3 + $0x20] sm:$0xff] %vm435_vm2, %v798_v44  ;;  %808 = vst.msk [vmem:[%s1618_s3 + $0x28] sm:$0xff] %vm435_vm2, %v799_v16 }
 0x1d1   :  { %809 = vst.msk [vmem:[%s1618_s3 + $0x30] sm:$0xff] %vm435_vm2, %v800_v46  ;;  %810 = vst.msk [vmem:[%s1618_s3 + $0x38] sm:$0xff] %vm435_vm2, %v801_v8 }
 0x1d2   :  { %811 = vst.msk [vmem:[%s1618_s3 + $0x40] sm:$0xff] %vm435_vm2, %v802_v47 }
 0x1d3   :  { %816 = vsyncpa [#allocation3], 1 }

</bundles_post_ra>
